<compile_context>
chip_gen: v6e
topology: v6e:2x2x1
jax: 0.10.0
libtpu: 0.0.40
codegen_flags: <defaults>
</compile_context>

<pallas_src>
import functools

import jax
import jax.numpy as jnp
from jax.experimental import pallas as pl
from jax.experimental.pallas import tpu as pltpu


# ------------------------- reflect-pad tap helpers ----------------------------

def _shift_getter(src, lanes):
    """get(s) -> array with get(s)[:, p] = src[:, (p + s) % lanes]; rolls cached by amount."""
    cache = {}

    def get(s):
        k = (-s) % lanes
        if k == 0:
            return src
        if k not in cache:
            cache[k] = pltpu.roll(src, k, axis=1)   # XLU rotate; own VLIW slot
        return cache[k]

    return get


def _reflect_axis(get, off, idx, extent, period):
    """Value at (axis index + off) under reflection padding, in the flat (C, H*W) layout.

    `get` shifts lanes (one axis step == `period` lanes), `idx` is the per-pixel axis
    index, `off` is the static signed offset (+-d or 0), `extent` the axis length.
    """
    if off == 0:
        return get(0)
    out = get(off * period)                       # valid wherever idx + off is in range
    if off < 0:
        for i in range(0, -off):                  # top/left boundary: reflect(-k) = k
            delta = -off - 2 * i
            out = jnp.where(idx == i, get(delta * period), out)
    else:
        for i in range(extent - off, extent):     # bottom/right: reflect(E-1+k) = E-1-k
            delta = 2 * (extent - 1 - i) - off
            out = jnp.where(idx == i, get(delta * period), out)
    return out


# --------------------------------- kernel ------------------------------------

def resnet_block_kernel(x_ref, w1_ref, w2_ref, o_ref, slab_ref, *, H, W, C, d, nb):
    """Processes `nb` images per grid step. Activations are (C, H*W): lanes = H*W."""
    HW = H * W
    f32, bf16 = jnp.float32, jnp.bfloat16
    inv_hw = 1.0 / HW

    # Per-pixel (row, col) indices of the flattened layout (cheap iota; no HBM operand).
    lane = jax.lax.broadcasted_iota(jnp.int32, (C, HW), 1)
    if W & (W - 1) == 0:
        col = lane & (W - 1)
        row = lane >> (W.bit_length() - 1)
    else:
        col = lane % W
        row = lane // W

    def instance_norm(h):
        s = jnp.sum(h, axis=1, keepdims=True)
        ss = jnp.sum(h * h, axis=1, keepdims=True)
        mean = s * inv_hw
        var = jnp.maximum(ss * inv_hw - mean * mean, 0.0)   # clamp: cancellation safety
        return (h - mean) * jax.lax.rsqrt(var + 1e-5)

    def conv3x3(a_f32, w_ref, dil):
        # Build the 9 reflect-padded taps in-kernel (roll + boundary selects), store each
        # (bf16) into the shared (9C, HW) VMEM slab, then ONE MXU matmul with K = 9*C.
        row_get = _shift_getter(a_f32, HW)
        t = 0
        for ky in range(3):
            rv = _reflect_axis(row_get, (ky - 1) * dil, row, H, W)
            col_get = _shift_getter(rv, HW)
            for kx in range(3):
                tap = _reflect_axis(col_get, (kx - 1) * dil, col, W, 1)
                slab_ref[t * C:(t + 1) * C, :] = tap.astype(bf16)
                t += 1
        return jnp.dot(w_ref[...], slab_ref[...], preferred_element_type=f32)

    for i in range(nb):                                     # unrolled images-per-step
        x_f32 = x_ref[i].astype(f32)                        # (C, HW); also the residual
        h = jnp.maximum(instance_norm(conv3x3(x_f32, w1_ref, d)), 0.0)   # conv1+IN+ReLU
        h2 = instance_norm(conv3x3(h, w2_ref, 1))                        # conv2+IN
        o_ref[i] = (x_f32 + h2).astype(o_ref.dtype)         # lane-dense (HW-wide) store


# --------------------------------- wrapper -----------------------------------

def _round_up(v, m):
    return -(-v // m) * m


def _images_per_step(N):
    # Amortize per-grid-step overhead at larger N, but keep >= 2 grid steps so
    # dimension_semantics=("parallel",) can still feed both v7x TensorCores.
    target = min(8, max(1, N // 2))
    for nb in range(target, 0, -1):
        if N % nb == 0:
            return nb
    return 1


@functools.partial(jax.jit, static_argnames=("dilation",))
def resnet_block_nchw(x, w1, b1, w2, b2, *, dilation=1):
    """x: (N, C, H, W). w*: (3, 3, Cin, Cout) (torch weight[o,i,ky,kx] == w[ky,kx,i,o]).
    b*: (C,) -- accepted but unused: a per-channel bias before an affine-free InstanceNorm
    is exactly cancelled by the mean subtraction (validated against the biased reference).
    Returns (N, C, H, W)."""
    del b1, b2
    N, C, H, W = x.shape
    d = int(dilation)
    assert 1 <= d < min(H, W), "reflection pad needs pad < spatial dims"
    HW = H * W
    CP = _round_up(C, 8)                    # sublane-aligned channel count
    nb = _images_per_step(N)
    bf16 = jnp.bfloat16

    # Zero-pad channels: padded channels stay exactly 0 end-to-end and are sliced off.
    x_flat = jnp.pad(x, ((0, 0), (0, CP - C), (0, 0), (0, 0))).reshape(N, CP, HW)

    # Weights -> (Cout_p, 9*Cin_p) bf16 matching the slab's (t*CP + ci) row order.
    def pack_w(w):
        wp = jnp.pad(w, ((0, 0), (0, 0), (0, CP - C), (0, CP - C)))
        return jnp.transpose(wp, (3, 0, 1, 2)).reshape(CP, 9 * CP).astype(bf16)

    w1m, w2m = pack_w(w1), pack_w(w2)

    kernel = functools.partial(resnet_block_kernel, H=H, W=W, C=CP, d=d, nb=nb)
    out_flat = pl.pallas_call(
        kernel,
        out_shape=jax.ShapeDtypeStruct((N, CP, HW), x.dtype),
        grid=(N // nb,),
        in_specs=[
            pl.BlockSpec((nb, CP, HW), lambda n: (n, 0, 0)),   # x (f32: taps + residual)
            pl.BlockSpec((CP, 9 * CP), lambda n: (0, 0)),      # w1 (resident across steps)
            pl.BlockSpec((CP, 9 * CP), lambda n: (0, 0)),      # w2 (resident across steps)
        ],
        out_specs=pl.BlockSpec((nb, CP, HW), lambda n: (n, 0, 0)),
        scratch_shapes=[pltpu.VMEM((9 * CP, HW), bf16)],        # shared im2col slab (both convs)
        compiler_params=pltpu.CompilerParams(
            dimension_semantics=("parallel",)),                 # batch across v7x's 2 TCs
    )(x_flat, w1m, w2m)
    return out_flat[:, :C, :].reshape(N, C, H, W)


# ------------------------ pure-JAX reference (f32) ----------------------------

def _reference_nchw(x, w1, b1, w2, b2, *, dilation=1):
    N, C, H, W = x.shape
    d = int(dilation)
    f32 = jnp.float32

    def conv3x3(xp, w, b, dil):
        acc = b.astype(f32)[None, :, None, None]
        for ky in range(3):
            for kx in range(3):
                patch = xp[:, :, ky * dil:ky * dil + H, kx * dil:kx * dil + W]
                acc = acc + jnp.einsum("nihw,io->nohw", patch, w[ky, kx].astype(f32))
        return acc

    def inorm(h, eps=1e-5):
        m = jnp.mean(h, axis=(2, 3), keepdims=True)
        v = jnp.mean(jnp.square(h - m), axis=(2, 3), keepdims=True)
        return (h - m) * jax.lax.rsqrt(v + eps)

    xf = x.astype(f32)
    xp = jnp.pad(xf, ((0, 0), (0, 0), (d, d), (d, d)), mode="reflect")
    h = jnp.maximum(inorm(conv3x3(xp, w1, b1, d)), 0.0)
    hp = jnp.pad(h, ((0, 0), (0, 0), (1, 1), (1, 1)), mode="reflect")
    h = inorm(conv3x3(hp, w2, b2, 1))
    return (xf + h).astype(x.dtype)


# ----------------------------------- main -------------------------------------

if __name__ == "__main__":
    N, C, H, W = 2, 4, 16, 16
    dilation = 1

    key = jax.random.PRNGKey(0)
    k_x, k_w1, k_b1, k_w2, k_b2 = jax.random.split(key, 5)
    x = jax.random.normal(k_x, (N, C, H, W), dtype=jnp.float32)
    # Conv weights as (kh, kw, Cin, Cout); biases present (use_spectral_norm=False).
    w1 = jax.random.normal(k_w1, (3, 3, C, C), dtype=jnp.float32) * 0.1
    b1 = jax.random.normal(k_b1, (C,), dtype=jnp.float32) * 0.1
    w2 = jax.random.normal(k_w2, (3, 3, C, C), dtype=jnp.float32) * 0.1
    b2 = jax.random.normal(k_b2, (C,), dtype=jnp.float32) * 0.1

    out = jax.block_until_ready(resnet_block_nchw(x, w1, b1, w2, b2, dilation=dilation))
    assert out.shape == (N, C, H, W), out.shape

    ref = jax.block_until_ready(_reference_nchw(x, w1, b1, w2, b2, dilation=dilation))
    max_err = float(jnp.max(jnp.abs(out - ref)))
    # bf16 MXU operands vs. f32 reference -> loose-but-meaningful tolerance (intentional).
    assert jnp.allclose(out, ref, atol=5e-2, rtol=5e-2), max_err

    print("KERNEL_OK")
</pallas_src>

<mosaic_0001>
module attributes {stable_mosaic.version = 11 : i64} {
  func.func @resnet_block_kernel(%arg0: i32, %arg1: memref<1x8x256xf32, #tpu.memory_space<vmem>>, %arg2: memref<8x72xbf16, #tpu.memory_space<vmem>>, %arg3: memref<8x72xbf16, #tpu.memory_space<vmem>>, %arg4: memref<1x8x256xf32, #tpu.memory_space<vmem>>, %arg5: memref<72x256xbf16, #tpu.memory_space<vmem>>) attributes {dimension_semantics = [#tpu.dimension_semantics<parallel>], iteration_bounds = array<i64: 2>, scalar_prefetch = 0 : i64, scratch_operands = 1 : i64, tpu.core_type = #tpu.core_type<tc>, window_params = [{transform_indices = @transform_0, window_bounds = array<i64: 1, 8, 256>}, {pipeline_mode = #tpu.pipeline_mode<synchronous>, transform_indices = @transform_1, window_bounds = array<i64: 8, 72>}, {pipeline_mode = #tpu.pipeline_mode<synchronous>, transform_indices = @transform_2, window_bounds = array<i64: 8, 72>}, {transform_indices = @transform_3, window_bounds = array<i64: 1, 8, 256>}]} {
    %0 = tpu.iota {dimensions = array<i32: 1>} : vector<8x256xi32>
    %c15_i32 = arith.constant 15 : i32
    %1 = vector.broadcast %c15_i32 : i32 to vector<8x256xi32>
    %2 = arith.andi %0, %1 : vector<8x256xi32>
    %c4_i32 = arith.constant 4 : i32
    %3 = vector.broadcast %c4_i32 : i32 to vector<8x256xi32>
    %4 = arith.shrsi %0, %3 : vector<8x256xi32>
    %c0 = arith.constant 0 : index
    %c0_0 = arith.constant 0 : index
    %c0_1 = arith.constant 0 : index
    %5 = vector.load %arg1[%c0, %c0_0, %c0_1] : memref<1x8x256xf32, #tpu.memory_space<vmem>>, vector<1x8x256xf32>
    %6 = vector.shape_cast %5 : vector<1x8x256xf32> to vector<8x256xf32>
    %c16_i32 = arith.constant 16 : i32
    %7 = tpu.dynamic_rotate %6 by %c16_i32 dim 1 : vector<8x256xf32>, i32 -> vector<8x256xf32>
    %c0_i32 = arith.constant 0 : i32
    %8 = vector.broadcast %c0_i32 : i32 to vector<8x256xi32>
    %9 = arith.cmpi eq, %4, %8 : vector<8x256xi32>
    %c240_i32 = arith.constant 240 : i32
    %10 = tpu.dynamic_rotate %6 by %c240_i32 dim 1 : vector<8x256xf32>, i32 -> vector<8x256xf32>
    %11 = arith.select %9, %10, %7 : vector<8x256xi1>, vector<8x256xf32>
    %c1_i32 = arith.constant 1 : i32
    %12 = tpu.dynamic_rotate %11 by %c1_i32 dim 1 : vector<8x256xf32>, i32 -> vector<8x256xf32>
    %c0_i32_2 = arith.constant 0 : i32
    %13 = vector.broadcast %c0_i32_2 : i32 to vector<8x256xi32>
    %14 = arith.cmpi eq, %2, %13 : vector<8x256xi32>
    %c255_i32 = arith.constant 255 : i32
    %15 = tpu.dynamic_rotate %11 by %c255_i32 dim 1 : vector<8x256xf32>, i32 -> vector<8x256xf32>
    %16 = arith.select %14, %15, %12 : vector<8x256xi1>, vector<8x256xf32>
    %17 = arith.truncf %16 : vector<8x256xf32> to vector<8x256xbf16>
    %c0_3 = arith.constant 0 : index
    %c0_4 = arith.constant 0 : index
    %18 = vector.load %arg5[%c0_3, %c0_4] : memref<72x256xbf16, #tpu.memory_space<vmem>>, vector<8x256xbf16>
    tpu.vector_store %arg5[%c0_3, %c0_4], %17 {strides = array<i32>} : memref<72x256xbf16, #tpu.memory_space<vmem>>, vector<8x256xbf16>,
    %19 = arith.truncf %11 : vector<8x256xf32> to vector<8x256xbf16>
    %c8 = arith.constant 8 : index
    %c0_5 = arith.constant 0 : index
    %20 = vector.load %arg5[%c8, %c0_5] : memref<72x256xbf16, #tpu.memory_space<vmem>>, vector<8x256xbf16>
    tpu.vector_store %arg5[%c8, %c0_5], %19 {strides = array<i32>} : memref<72x256xbf16, #tpu.memory_space<vmem>>, vector<8x256xbf16>,
    %c15_i32_6 = arith.constant 15 : i32
    %21 = vector.broadcast %c15_i32_6 : i32 to vector<8x256xi32>
    %22 = arith.cmpi eq, %2, %21 : vector<8x256xi32>
    %23 = arith.select %22, %12, %15 : vector<8x256xi1>, vector<8x256xf32>
    %24 = arith.truncf %23 : vector<8x256xf32> to vector<8x256xbf16>
    %c16 = arith.constant 16 : index
    %c0_7 = arith.constant 0 : index
    %25 = vector.load %arg5[%c16, %c0_7] : memref<72x256xbf16, #tpu.memory_space<vmem>>, vector<8x256xbf16>
    tpu.vector_store %arg5[%c16, %c0_7], %24 {strides = array<i32>} : memref<72x256xbf16, #tpu.memory_space<vmem>>, vector<8x256xbf16>,
    %c1_i32_8 = arith.constant 1 : i32
    %26 = tpu.dynamic_rotate %6 by %c1_i32_8 dim 1 : vector<8x256xf32>, i32 -> vector<8x256xf32>
    %c0_i32_9 = arith.constant 0 : i32
    %27 = vector.broadcast %c0_i32_9 : i32 to vector<8x256xi32>
    %28 = arith.cmpi eq, %2, %27 : vector<8x256xi32>
    %c255_i32_10 = arith.constant 255 : i32
    %29 = tpu.dynamic_rotate %6 by %c255_i32_10 dim 1 : vector<8x256xf32>, i32 -> vector<8x256xf32>
    %30 = arith.select %28, %29, %26 : vector<8x256xi1>, vector<8x256xf32>
    %31 = arith.truncf %30 : vector<8x256xf32> to vector<8x256xbf16>
    %c24 = arith.constant 24 : index
    %c0_11 = arith.constant 0 : index
    %32 = vector.load %arg5[%c24, %c0_11] : memref<72x256xbf16, #tpu.memory_space<vmem>>, vector<8x256xbf16>
    tpu.vector_store %arg5[%c24, %c0_11], %31 {strides = array<i32>} : memref<72x256xbf16, #tpu.memory_space<vmem>>, vector<8x256xbf16>,
    %33 = arith.truncf %6 : vector<8x256xf32> to vector<8x256xbf16>
    %c32 = arith.constant 32 : index
    %c0_12 = arith.constant 0 : index
    %34 = vector.load %arg5[%c32, %c0_12] : memref<72x256xbf16, #tpu.memory_space<vmem>>, vector<8x256xbf16>
    tpu.vector_store %arg5[%c32, %c0_12], %33 {strides = array<i32>} : memref<72x256xbf16, #tpu.memory_space<vmem>>, vector<8x256xbf16>,
    %c15_i32_13 = arith.constant 15 : i32
    %35 = vector.broadcast %c15_i32_13 : i32 to vector<8x256xi32>
    %36 = arith.cmpi eq, %2, %35 : vector<8x256xi32>
    %37 = arith.select %36, %26, %29 : vector<8x256xi1>, vector<8x256xf32>
    %38 = arith.truncf %37 : vector<8x256xf32> to vector<8x256xbf16>
    %c40 = arith.constant 40 : index
    %c0_14 = arith.constant 0 : index
    %39 = vector.load %arg5[%c40, %c0_14] : memref<72x256xbf16, #tpu.memory_space<vmem>>, vector<8x256xbf16>
    tpu.vector_store %arg5[%c40, %c0_14], %38 {strides = array<i32>} : memref<72x256xbf16, #tpu.memory_space<vmem>>, vector<8x256xbf16>,
    %c15_i32_15 = arith.constant 15 : i32
    %40 = vector.broadcast %c15_i32_15 : i32 to vector<8x256xi32>
    %41 = arith.cmpi eq, %4, %40 : vector<8x256xi32>
    %42 = arith.select %41, %7, %10 : vector<8x256xi1>, vector<8x256xf32>
    %c1_i32_16 = arith.constant 1 : i32
    %43 = tpu.dynamic_rotate %42 by %c1_i32_16 dim 1 : vector<8x256xf32>, i32 -> vector<8x256xf32>
    %c0_i32_17 = arith.constant 0 : i32
    %44 = vector.broadcast %c0_i32_17 : i32 to vector<8x256xi32>
    %45 = arith.cmpi eq, %2, %44 : vector<8x256xi32>
    %c255_i32_18 = arith.constant 255 : i32
    %46 = tpu.dynamic_rotate %42 by %c255_i32_18 dim 1 : vector<8x256xf32>, i32 -> vector<8x256xf32>
    %47 = arith.select %45, %46, %43 : vector<8x256xi1>, vector<8x256xf32>
    %48 = arith.truncf %47 : vector<8x256xf32> to vector<8x256xbf16>
    %c48 = arith.constant 48 : index
    %c0_19 = arith.constant 0 : index
    %49 = vector.load %arg5[%c48, %c0_19] : memref<72x256xbf16, #tpu.memory_space<vmem>>, vector<8x256xbf16>
    tpu.vector_store %arg5[%c48, %c0_19], %48 {strides = array<i32>} : memref<72x256xbf16, #tpu.memory_space<vmem>>, vector<8x256xbf16>,
    %50 = arith.truncf %42 : vector<8x256xf32> to vector<8x256xbf16>
    %c56 = arith.constant 56 : index
    %c0_20 = arith.constant 0 : index
    %51 = vector.load %arg5[%c56, %c0_20] : memref<72x256xbf16, #tpu.memory_space<vmem>>, vector<8x256xbf16>
    tpu.vector_store %arg5[%c56, %c0_20], %50 {strides = array<i32>} : memref<72x256xbf16, #tpu.memory_space<vmem>>, vector<8x256xbf16>,
    %c15_i32_21 = arith.constant 15 : i32
    %52 = vector.broadcast %c15_i32_21 : i32 to vector<8x256xi32>
    %53 = arith.cmpi eq, %2, %52 : vector<8x256xi32>
    %54 = arith.select %53, %43, %46 : vector<8x256xi1>, vector<8x256xf32>
    %55 = arith.truncf %54 : vector<8x256xf32> to vector<8x256xbf16>
    %c64 = arith.constant 64 : index
    %c0_22 = arith.constant 0 : index
    %56 = vector.load %arg5[%c64, %c0_22] : memref<72x256xbf16, #tpu.memory_space<vmem>>, vector<8x256xbf16>
    tpu.vector_store %arg5[%c64, %c0_22], %55 {strides = array<i32>} : memref<72x256xbf16, #tpu.memory_space<vmem>>, vector<8x256xbf16>,
    %c0_23 = arith.constant 0 : index
    %c0_24 = arith.constant 0 : index
    %57 = vector.load %arg2[%c0_23, %c0_24] : memref<8x72xbf16, #tpu.memory_space<vmem>>, vector<8x72xbf16>
    %c0_25 = arith.constant 0 : index
    %c0_26 = arith.constant 0 : index
    %58 = vector.load %arg5[%c0_25, %c0_26] : memref<72x256xbf16, #tpu.memory_space<vmem>>, vector<72x256xbf16>
    %cst = arith.constant dense<0.000000e+00> : vector<8x256xf32>
    %59 = tpu.matmul %57, %58, %cst {dimension_numbers = #tpu.dot_dimension_numbers<[1], [0], [0], [1], [0, 0, 1, 1], [], []>} : vector<8x72xbf16>, vector<72x256xbf16>, vector<8x256xf32> -> vector<8x256xf32>
    %cst_27 = arith.constant dense<0.000000e+00> : vector<8xf32>
    %60 = vector.multi_reduction <add>, %59, %cst_27 [1] : vector<8x256xf32> to vector<8xf32>
    %61 = vector.shape_cast %60 : vector<8xf32> to vector<8x1xf32>
    %62 = arith.mulf %59, %59 : vector<8x256xf32>
    %cst_28 = arith.constant dense<0.000000e+00> : vector<8xf32>
    %63 = vector.multi_reduction <add>, %62, %cst_28 [1] : vector<8x256xf32> to vector<8xf32>
    %64 = vector.shape_cast %63 : vector<8xf32> to vector<8x1xf32>
    %cst_29 = arith.constant 3.906250e-03 : f32
    %65 = vector.broadcast %cst_29 : f32 to vector<8x1xf32>
    %66 = arith.mulf %61, %65 : vector<8x1xf32>
    %cst_30 = arith.constant 3.906250e-03 : f32
    %67 = vector.broadcast %cst_30 : f32 to vector<8x1xf32>
    %68 = arith.mulf %64, %67 : vector<8x1xf32>
    %69 = arith.mulf %66, %66 : vector<8x1xf32>
    %70 = arith.subf %68, %69 : vector<8x1xf32>
    %cst_31 = arith.constant 0.000000e+00 : f32
    %71 = vector.broadcast %cst_31 : f32 to vector<8x1xf32>
    %72 = arith.maximumf %70, %71 : vector<8x1xf32>
    %73 = vector.broadcast %66 : vector<8x1xf32> to vector<8x256xf32>
    %74 = arith.subf %59, %73 : vector<8x256xf32>
    %cst_32 = arith.constant 9.99999974E-6 : f32
    %75 = vector.broadcast %cst_32 : f32 to vector<8x1xf32>
    %76 = arith.addf %72, %75 : vector<8x1xf32>
    %77 = math.rsqrt %76 : vector<8x1xf32>
    %78 = vector.broadcast %77 : vector<8x1xf32> to vector<8x256xf32>
    %79 = arith.mulf %74, %78 : vector<8x256xf32>
    %cst_33 = arith.constant 0.000000e+00 : f32
    %80 = vector.broadcast %cst_33 : f32 to vector<8x256xf32>
    %81 = arith.maximumf %79, %80 : vector<8x256xf32>
    %c16_i32_34 = arith.constant 16 : i32
    %82 = tpu.dynamic_rotate %81 by %c16_i32_34 dim 1 : vector<8x256xf32>, i32 -> vector<8x256xf32>
    %c0_i32_35 = arith.constant 0 : i32
    %83 = vector.broadcast %c0_i32_35 : i32 to vector<8x256xi32>
    %84 = arith.cmpi eq, %4, %83 : vector<8x256xi32>
    %c240_i32_36 = arith.constant 240 : i32
    %85 = tpu.dynamic_rotate %81 by %c240_i32_36 dim 1 : vector<8x256xf32>, i32 -> vector<8x256xf32>
    %86 = arith.select %84, %85, %82 : vector<8x256xi1>, vector<8x256xf32>
    %c1_i32_37 = arith.constant 1 : i32
    %87 = tpu.dynamic_rotate %86 by %c1_i32_37 dim 1 : vector<8x256xf32>, i32 -> vector<8x256xf32>
    %c0_i32_38 = arith.constant 0 : i32
    %88 = vector.broadcast %c0_i32_38 : i32 to vector<8x256xi32>
    %89 = arith.cmpi eq, %2, %88 : vector<8x256xi32>
    %c255_i32_39 = arith.constant 255 : i32
    %90 = tpu.dynamic_rotate %86 by %c255_i32_39 dim 1 : vector<8x256xf32>, i32 -> vector<8x256xf32>
    %91 = arith.select %89, %90, %87 : vector<8x256xi1>, vector<8x256xf32>
    %92 = arith.truncf %91 : vector<8x256xf32> to vector<8x256xbf16>
    %c0_40 = arith.constant 0 : index
    %c0_41 = arith.constant 0 : index
    %93 = vector.load %arg5[%c0_40, %c0_41] : memref<72x256xbf16, #tpu.memory_space<vmem>>, vector<8x256xbf16>
    tpu.vector_store %arg5[%c0_40, %c0_41], %92 {strides = array<i32>} : memref<72x256xbf16, #tpu.memory_space<vmem>>, vector<8x256xbf16>,
    %94 = arith.truncf %86 : vector<8x256xf32> to vector<8x256xbf16>
    %c8_42 = arith.constant 8 : index
    %c0_43 = arith.constant 0 : index
    %95 = vector.load %arg5[%c8_42, %c0_43] : memref<72x256xbf16, #tpu.memory_space<vmem>>, vector<8x256xbf16>
    tpu.vector_store %arg5[%c8_42, %c0_43], %94 {strides = array<i32>} : memref<72x256xbf16, #tpu.memory_space<vmem>>, vector<8x256xbf16>,
    %c15_i32_44 = arith.constant 15 : i32
    %96 = vector.broadcast %c15_i32_44 : i32 to vector<8x256xi32>
    %97 = arith.cmpi eq, %2, %96 : vector<8x256xi32>
    %98 = arith.select %97, %87, %90 : vector<8x256xi1>, vector<8x256xf32>
    %99 = arith.truncf %98 : vector<8x256xf32> to vector<8x256xbf16>
    %c16_45 = arith.constant 16 : index
    %c0_46 = arith.constant 0 : index
    %100 = vector.load %arg5[%c16_45, %c0_46] : memref<72x256xbf16, #tpu.memory_space<vmem>>, vector<8x256xbf16>
    tpu.vector_store %arg5[%c16_45, %c0_46], %99 {strides = array<i32>} : memref<72x256xbf16, #tpu.memory_space<vmem>>, vector<8x256xbf16>,
    %c1_i32_47 = arith.constant 1 : i32
    %101 = tpu.dynamic_rotate %81 by %c1_i32_47 dim 1 : vector<8x256xf32>, i32 -> vector<8x256xf32>
    %c0_i32_48 = arith.constant 0 : i32
    %102 = vector.broadcast %c0_i32_48 : i32 to vector<8x256xi32>
    %103 = arith.cmpi eq, %2, %102 : vector<8x256xi32>
    %c255_i32_49 = arith.constant 255 : i32
    %104 = tpu.dynamic_rotate %81 by %c255_i32_49 dim 1 : vector<8x256xf32>, i32 -> vector<8x256xf32>
    %105 = arith.select %103, %104, %101 : vector<8x256xi1>, vector<8x256xf32>
    %106 = arith.truncf %105 : vector<8x256xf32> to vector<8x256xbf16>
    %c24_50 = arith.constant 24 : index
    %c0_51 = arith.constant 0 : index
    %107 = vector.load %arg5[%c24_50, %c0_51] : memref<72x256xbf16, #tpu.memory_space<vmem>>, vector<8x256xbf16>
    tpu.vector_store %arg5[%c24_50, %c0_51], %106 {strides = array<i32>} : memref<72x256xbf16, #tpu.memory_space<vmem>>, vector<8x256xbf16>,
    %108 = arith.truncf %81 : vector<8x256xf32> to vector<8x256xbf16>
    %c32_52 = arith.constant 32 : index
    %c0_53 = arith.constant 0 : index
    %109 = vector.load %arg5[%c32_52, %c0_53] : memref<72x256xbf16, #tpu.memory_space<vmem>>, vector<8x256xbf16>
    tpu.vector_store %arg5[%c32_52, %c0_53], %108 {strides = array<i32>} : memref<72x256xbf16, #tpu.memory_space<vmem>>, vector<8x256xbf16>,
    %c15_i32_54 = arith.constant 15 : i32
    %110 = vector.broadcast %c15_i32_54 : i32 to vector<8x256xi32>
    %111 = arith.cmpi eq, %2, %110 : vector<8x256xi32>
    %112 = arith.select %111, %101, %104 : vector<8x256xi1>, vector<8x256xf32>
    %113 = arith.truncf %112 : vector<8x256xf32> to vector<8x256xbf16>
    %c40_55 = arith.constant 40 : index
    %c0_56 = arith.constant 0 : index
    %114 = vector.load %arg5[%c40_55, %c0_56] : memref<72x256xbf16, #tpu.memory_space<vmem>>, vector<8x256xbf16>
    tpu.vector_store %arg5[%c40_55, %c0_56], %113 {strides = array<i32>} : memref<72x256xbf16, #tpu.memory_space<vmem>>, vector<8x256xbf16>,
    %c15_i32_57 = arith.constant 15 : i32
    %115 = vector.broadcast %c15_i32_57 : i32 to vector<8x256xi32>
    %116 = arith.cmpi eq, %4, %115 : vector<8x256xi32>
    %117 = arith.select %116, %82, %85 : vector<8x256xi1>, vector<8x256xf32>
    %c1_i32_58 = arith.constant 1 : i32
    %118 = tpu.dynamic_rotate %117 by %c1_i32_58 dim 1 : vector<8x256xf32>, i32 -> vector<8x256xf32>
    %c0_i32_59 = arith.constant 0 : i32
    %119 = vector.broadcast %c0_i32_59 : i32 to vector<8x256xi32>
    %120 = arith.cmpi eq, %2, %119 : vector<8x256xi32>
    %c255_i32_60 = arith.constant 255 : i32
    %121 = tpu.dynamic_rotate %117 by %c255_i32_60 dim 1 : vector<8x256xf32>, i32 -> vector<8x256xf32>
    %122 = arith.select %120, %121, %118 : vector<8x256xi1>, vector<8x256xf32>
    %123 = arith.truncf %122 : vector<8x256xf32> to vector<8x256xbf16>
    %c48_61 = arith.constant 48 : index
    %c0_62 = arith.constant 0 : index
    %124 = vector.load %arg5[%c48_61, %c0_62] : memref<72x256xbf16, #tpu.memory_space<vmem>>, vector<8x256xbf16>
    tpu.vector_store %arg5[%c48_61, %c0_62], %123 {strides = array<i32>} : memref<72x256xbf16, #tpu.memory_space<vmem>>, vector<8x256xbf16>,
    %125 = arith.truncf %117 : vector<8x256xf32> to vector<8x256xbf16>
    %c56_63 = arith.constant 56 : index
    %c0_64 = arith.constant 0 : index
    %126 = vector.load %arg5[%c56_63, %c0_64] : memref<72x256xbf16, #tpu.memory_space<vmem>>, vector<8x256xbf16>
    tpu.vector_store %arg5[%c56_63, %c0_64], %125 {strides = array<i32>} : memref<72x256xbf16, #tpu.memory_space<vmem>>, vector<8x256xbf16>,
    %c15_i32_65 = arith.constant 15 : i32
    %127 = vector.broadcast %c15_i32_65 : i32 to vector<8x256xi32>
    %128 = arith.cmpi eq, %2, %127 : vector<8x256xi32>
    %129 = arith.select %128, %118, %121 : vector<8x256xi1>, vector<8x256xf32>
    %130 = arith.truncf %129 : vector<8x256xf32> to vector<8x256xbf16>
    %c64_66 = arith.constant 64 : index
    %c0_67 = arith.constant 0 : index
    %131 = vector.load %arg5[%c64_66, %c0_67] : memref<72x256xbf16, #tpu.memory_space<vmem>>, vector<8x256xbf16>
    tpu.vector_store %arg5[%c64_66, %c0_67], %130 {strides = array<i32>} : memref<72x256xbf16, #tpu.memory_space<vmem>>, vector<8x256xbf16>,
    %c0_68 = arith.constant 0 : index
    %c0_69 = arith.constant 0 : index
    %132 = vector.load %arg3[%c0_68, %c0_69] : memref<8x72xbf16, #tpu.memory_space<vmem>>, vector<8x72xbf16>
    %c0_70 = arith.constant 0 : index
    %c0_71 = arith.constant 0 : index
    %133 = vector.load %arg5[%c0_70, %c0_71] : memref<72x256xbf16, #tpu.memory_space<vmem>>, vector<72x256xbf16>
    %cst_72 = arith.constant dense<0.000000e+00> : vector<8x256xf32>
    %134 = tpu.matmul %132, %133, %cst_72 {dimension_numbers = #tpu.dot_dimension_numbers<[1], [0], [0], [1], [0, 0, 1, 1], [], []>} : vector<8x72xbf16>, vector<72x256xbf16>, vector<8x256xf32> -> vector<8x256xf32>
    %cst_73 = arith.constant dense<0.000000e+00> : vector<8xf32>
    %135 = vector.multi_reduction <add>, %134, %cst_73 [1] : vector<8x256xf32> to vector<8xf32>
    %136 = vector.shape_cast %135 : vector<8xf32> to vector<8x1xf32>
    %137 = arith.mulf %134, %134 : vector<8x256xf32>
    %cst_74 = arith.constant dense<0.000000e+00> : vector<8xf32>
    %138 = vector.multi_reduction <add>, %137, %cst_74 [1] : vector<8x256xf32> to vector<8xf32>
    %139 = vector.shape_cast %138 : vector<8xf32> to vector<8x1xf32>
    %cst_75 = arith.constant 3.906250e-03 : f32
    %140 = vector.broadcast %cst_75 : f32 to vector<8x1xf32>
    %141 = arith.mulf %136, %140 : vector<8x1xf32>
    %cst_76 = arith.constant 3.906250e-03 : f32
    %142 = vector.broadcast %cst_76 : f32 to vector<8x1xf32>
    %143 = arith.mulf %139, %142 : vector<8x1xf32>
    %144 = arith.mulf %141, %141 : vector<8x1xf32>
    %145 = arith.subf %143, %144 : vector<8x1xf32>
    %cst_77 = arith.constant 0.000000e+00 : f32
    %146 = vector.broadcast %cst_77 : f32 to vector<8x1xf32>
    %147 = arith.maximumf %145, %146 : vector<8x1xf32>
    %148 = vector.broadcast %141 : vector<8x1xf32> to vector<8x256xf32>
    %149 = arith.subf %134, %148 : vector<8x256xf32>
    %cst_78 = arith.constant 9.99999974E-6 : f32
    %150 = vector.broadcast %cst_78 : f32 to vector<8x1xf32>
    %151 = arith.addf %147, %150 : vector<8x1xf32>
    %152 = math.rsqrt %151 : vector<8x1xf32>
    %153 = vector.broadcast %152 : vector<8x1xf32> to vector<8x256xf32>
    %154 = arith.mulf %149, %153 : vector<8x256xf32>
    %155 = arith.addf %6, %154 : vector<8x256xf32>
    %c0_79 = arith.constant 0 : index
    %c0_80 = arith.constant 0 : index
    %c0_81 = arith.constant 0 : index
    %156 = vector.load %arg4[%c0_79, %c0_80, %c0_81] : memref<1x8x256xf32, #tpu.memory_space<vmem>>, vector<1x8x256xf32>
    %157 = vector.shape_cast %156 : vector<1x8x256xf32> to vector<8x256xf32>
    %158 = vector.shape_cast %155 : vector<8x256xf32> to vector<1x8x256xf32>
    tpu.vector_store %arg4[%c0_79, %c0_80, %c0_81], %158 {strides = array<i32>} : memref<1x8x256xf32, #tpu.memory_space<vmem>>, vector<1x8x256xf32>,
    return
  }
  func.func @transform_0(%arg0: i32) -> (i32, i32, i32) {
    %c0_i32 = arith.constant 0 : i32
    %c0_i32_0 = arith.constant 0 : i32
    %c0_i32_1 = arith.constant 0 : i32
    return %arg0, %c0_i32, %c0_i32_0 : i32, i32, i32
  }
  func.func @transform_1(%arg0: i32) -> (i32, i32) {
    %c0_i32 = arith.constant 0 : i32
    %c0_i32_0 = arith.constant 0 : i32
    %c0_i32_1 = arith.constant 0 : i32
    return %c0_i32, %c0_i32_0 : i32, i32
  }
  func.func @transform_2(%arg0: i32) -> (i32, i32) {
    %c0_i32 = arith.constant 0 : i32
    %c0_i32_0 = arith.constant 0 : i32
    %c0_i32_1 = arith.constant 0 : i32
    return %c0_i32, %c0_i32_0 : i32, i32
  }
  func.func @transform_3(%arg0: i32) -> (i32, i32, i32) {
    %c0_i32 = arith.constant 0 : i32
    %c0_i32_0 = arith.constant 0 : i32
    %c0_i32_1 = arith.constant 0 : i32
    return %arg0, %c0_i32, %c0_i32_0 : i32, i32, i32
  }
}

</mosaic_0001>

<bundles_post_ra>
// kernel: resnet_block_nchw.1
= control target key start
LH: loop header
LB: loop body
LE: loop exit
PB: predicated region body
PF: predicated region fallthrough
CT: control target
= control target key end

     0   :  { %s1017_s12 = smov 0   ;;  %s1282_s0 = inlined_call_operand.vmem [shape: f32[2,8,256], index: 0, kind: input, shape index: {}]   ;;  %s1283_s1 = inlined_call_operand.vmem [shape: bf16[8,72], index: 1, kind: input, shape index: {}]   ;;  %s1284_s2 = inlined_call_operand.vmem [shape: bf16[8,72], index: 2, kind: input, shape index: {}]   ;;  %s1285_s3 = inlined_call_operand.vmem [shape: f32[2,8,256], index: 3, kind: output, shape index: {}]  }
   0x1 LB: > { %s794_s13 = sadd.s32 4294967295, %s990_s12   ;;  %p798_p0 = scmp.ge.s32.totalorder %s990_s12, 1  ;;  %s990_s12 = sphi %s1017_s12, %s13_s12  }
   0x2   : > { %p137_p1 = scmp.lt.s32.totalorder %s990_s12, 3 }
   0x4   : > { %p138_p2 = pnand %p798_p0, %p137_p1 }
   0x5   : > { %p161_p3 = scmp.lt.s32.totalorder (!%p138_p2), %s794_s13, 1  ;;  %s992_s18 = smov (!%p138_p2), 16  }
   0x6   : > { %141 = sbr.rel (%p138_p2) target bundleno = 1279 (0x4ff), region = 32  ;;  %s993_s19 = smov (!%p138_p2), 112  }
   0x7   : > { %s994_s20 = smov (!%p138_p2), 1   ;;  %s995_s21 = smov (!%p138_p2), 127  }
   0xb   : > { %s1303_s13 = smov (!%p161_p3, %s794_s13), 1  ;;  %v172_v3 = vlaneseq  ;;  %v996_v28 = vmov 0   ;;  %vm397_vm11 = vcmask 1043456   ;;  %vm393_vm13 = vcmask 588800   ;;  %v611_v41 = vld [vmem:[%s1284_s2] sm:$0xf] }
   0xc   : > { %s847_s14 = sshll.u32 %s1303_s13, 4  ;;  %436 = vmatprep.mubr.bf16.mxu0 %v996_v28  ;;  %707 = vmatprep.mubr.bf16.mxu1 %v996_v28 }
   0xd   : > { %s165_s17 = scalar_lea.vmem %s1282_s0, %s847_s14  ;;  %v1042_v4 = vand.u32 127, %v172_v3  ;;  %s170_s28 = scalar_lea.vmem %s1285_s3, %s847_s14 }
   0xe   : > { %v1033_v0 = vld [vmem:[%s165_s17] sm:$0xff]  ;;  %v1035_v1 = vld [vmem:[%s165_s17 + $0x8] sm:$0xff] }
   0xf   : > { %v900_v2 = vpack.i.bf16 %v1035_v1, %v1033_v0  ;;  %v174_v5 = vadd.s32 128, %v1042_v4  ;;  %v177_v7 = vshra.s32 %v1042_v4, 4  ;;  %vm185_vm0 = vcmp.lt.s32.totalorder %v1042_v4, 16 }
  0x10   : > { %vm194_vm1 = vcmp.lt.s32.totalorder %v1042_v4, 112  ;;  %v175_v32 = vand.u32 15, %v1042_v4  ;;  %vm203_vm6 = vcmp.lt.s32.totalorder %v1042_v4, 1  ;;  %vm212_vm7 = vcmp.lt.s32.totalorder %v1042_v4, 127 }
  0x11   : > { %901 = vrot.lane.b32.xlu0 %v900_v2, %s992_s18  ;;  %v178_v8 = vshra.s32 %v174_v5, 4  ;;  %vm1048_vm2 = vcmp.eq.s32.totalorder %v177_v7, 15  ;;  %vm1052_vm3 = vcmp.eq.s32.totalorder %v177_v7, 0  ;;  %v176_v29 = vand.u32 15, %v174_v5 }
  0x12   : > { %vm1101_vm9 = vcmp.eq.s32.totalorder %v175_v32, 15  ;;  %vm1109_vm12 = vcmp.eq.s32.totalorder %v175_v32, 0 }
  0x13   : > { %vm1056_vm4 = vcmp.eq.s32.totalorder %v178_v8, 15  ;;  %vm1060_vm5 = vcmp.eq.s32.totalorder %v178_v8, 0  ;;  %vm1097_vm8 = vcmp.eq.s32.totalorder %v176_v29, 15  ;;  %vm1105_vm10 = vcmp.eq.s32.totalorder %v176_v29, 0 }
  0x15   : > { %906 = vrot.lane.b32.xlu0 %v900_v2, %s993_s19 }
  0x19   : > { %921 = vrot.lane.b32.xlu0 %v900_v2, %s994_s20 }
  0x83   : > { %v902_v6 = vpop.permute.xlu0 %901 }
  0x84   : > { %v904_v9 = vunpack.i.h.bf16 %v902_v6  ;;  %v903_v10 = vunpack.i.l.bf16 %v902_v6 }
  0x86   : > { %v186_v18 = vsel %vm185_vm0, %v903_v10, %v904_v9  ;;  %v187_v19 = vsel %vm185_vm0, %v904_v9, %v903_v10 }
  0x87   : > { %v907_v11 = vpop.permute.xlu0 %906 }
  0x88   : > { %v909_v14 = vunpack.i.h.bf16 %v907_v11  ;;  %v908_v15 = vunpack.i.l.bf16 %v907_v11 }
  0x8a   : > { %v195_v20 = vsel %vm194_vm1, %v908_v15, %v909_v14  ;;  %v196_v21 = vsel %vm194_vm1, %v909_v14, %v908_v15 }
  0x8b   : > { %v1074_v22 = vsel %vm1048_vm2, %v187_v19, %v195_v20  ;;  %v294_v23 = vsel %vm1056_vm4, %v186_v18, %v196_v21  ;;  %v1080_v24 = vsel %vm1052_vm3, %v195_v20, %v187_v19  ;;  %v1084_v25 = vsel %vm1060_vm5, %v196_v21, %v186_v18  ;;  %v922_v31 = vpop.permute.xlu0 %921 }
  0x8c   : > { %v910_v26 = vpack.i.bf16 %v294_v23, %v1074_v22  ;;  %v930_v27 = vpack.i.bf16 %v1084_v25, %v1080_v24  ;;  %v924_v35 = vunpack.i.h.bf16 %v922_v31  ;;  %v923_v36 = vunpack.i.l.bf16 %v922_v31 }
  0x8e   : > { %911 = vrot.lane.b32.xlu1 %v910_v26, %s994_s20  ;;  %931 = vrot.lane.b32.xlu0 %v930_v27, %s994_s20  ;;  %v252_v49 = vsel %vm203_vm6, %v923_v36, %v924_v35  ;;  %v253_v58 = vsel %vm203_vm6, %v924_v35, %v923_v36 }
  0x92   : > { %916 = vrot.lane.b32.xlu1 %v910_v26, %s995_s21 }
  0x96   : > { %926 = vrot.lane.b32.xlu1 %v900_v2, %s995_s21 }
  0x9a   : > { %936 = vrot.lane.b32.xlu1 %v930_v27, %s995_s21 }
 0x100   : > { %v912_v30 = vpop.permute.xlu1 %911  ;;  %v932_v44 = vpop.permute.xlu0 %931 }
 0x101   : > { %v914_v33 = vunpack.i.h.bf16 %v912_v30  ;;  %v913_v34 = vunpack.i.l.bf16 %v912_v30  ;;  %v934_v59 = vunpack.i.h.bf16 %v932_v44  ;;  %v933_v60 = vunpack.i.l.bf16 %v932_v44 }
 0x103   : > { %v299_v45 = vsel %vm203_vm6, %v913_v34, %v914_v33  ;;  %v300_v47 = vsel %vm203_vm6, %v914_v33, %v913_v34  ;;  %v204_v14 = vsel %vm203_vm6, %v933_v60, %v934_v59  ;;  %v338_v33 = vld [vmem:[%s1283_s1] sm:$0xf] }
 0x104   : > { %v917_v37 = vpop.permute.xlu1 %916 }
 0x105   : > { %v919_v39 = vunpack.i.h.bf16 %v917_v37  ;;  %v918_v40 = vunpack.i.l.bf16 %v917_v37 }
 0x107   : > { %v306_v46 = vsel %vm212_vm7, %v919_v39, %v918_v40  ;;  %v305_v48 = vsel %vm212_vm7, %v918_v40, %v919_v39 }
 0x108   : > { %v927_v50 = vpop.permute.xlu1 %926  ;;  %v328_v51 = vsel %vm1097_vm8, %v299_v45, %v306_v46  ;;  %v327_v52 = vsel %vm1101_vm9, %v300_v47, %v305_v48  ;;  %v308_v53 = vsel %vm1105_vm10, %v306_v46, %v299_v45  ;;  %v307_v61 = vsel %vm1109_vm12, %v305_v48, %v300_v47 }
 0x109   : > { %v929_v54 = vunpack.i.h.bf16 %v927_v50  ;;  %v928_v55 = vunpack.i.l.bf16 %v927_v50  ;;  %v876_v56 = vpack.c.bf16 %v328_v51, %v328_v51  ;;  %v875_v57 = vpack.c.bf16 %v327_v52, %v327_v52 }
 0x10a   : > { %v874_v3 = vpack.c.bf16 %v294_v23, %v308_v53  ;;  %v873_v11 = vpack.c.bf16 %v1074_v22, %v307_v61  ;;  %v205_v22 = vsel %vm203_vm6, %v934_v59, %v933_v60 }
 0x10b   : > { %v258_v62 = vsel %vm212_vm7, %v928_v55, %v929_v54  ;;  %v259_v63 = vsel %vm212_vm7, %v929_v54, %v928_v55  ;;  %822 = vmatprep.subr.msk.bf16.mxu0 %vm397_vm11, %v876_v56  ;;  %v399_v2 = vsel %vm397_vm11, %v875_v57, 0 }
 0x10c   : > { %411 = vmatpush1.bf16.msra.mxu0 %v399_v2  ;;  %v937_v5 = vpop.permute.xlu1 %936  ;;  %v281_v6 = vsel %vm1097_vm8, %v252_v49, %v259_v63  ;;  %v280_v10 = vsel %vm1101_vm9, %v253_v58, %v258_v62  ;;  %v261_v21 = vsel %vm1105_vm10, %v259_v63, %v252_v49  ;;  %v260_v27 = vsel %vm1109_vm12, %v258_v62, %v253_v58 }
 0x10d   : > { %v939_v7 = vunpack.i.h.bf16 %v937_v5  ;;  %v938_v8 = vunpack.i.l.bf16 %v937_v5  ;;  %412 = vmatprep.subr.bf16.mxu0 %v874_v3  ;;  %v872_v9 = vpack.c.bf16 %v281_v6, %v1035_v1  ;;  %v871_v19 = vpack.c.bf16 %v280_v10, %v1033_v0 }
 0x10f   : > { %v214_v15 = vsel %vm212_vm7, %v939_v7, %v938_v8  ;;  %v213_v18 = vsel %vm212_vm7, %v938_v8, %v939_v7 }
 0x110   : > { %413 = vmatpush1.bf16.msra.mxu0 %v873_v11  ;;  %v238_v20 = vsel %vm1097_vm8, %v204_v14, %v214_v15  ;;  %v237_v26 = vsel %vm1101_vm9, %v205_v22, %v213_v18  ;;  %v216_v28 = vsel %vm1105_vm10, %v214_v15, %v204_v14  ;;  %v215_v31 = vsel %vm1109_vm12, %v213_v18, %v205_v22 }
 0x111   : > { %414 = vmatprep.subr.bf16.mxu0 %v872_v9  ;;  %v870_v23 = vpack.c.bf16 %v261_v21, %v238_v20  ;;  %v869_v29 = vpack.c.bf16 %v260_v27, %v237_v26  ;;  %v868_v30 = vpack.c.bf16 %v1084_v25, %v216_v28  ;;  %v867_v32 = vpack.c.bf16 %v1080_v24, %v215_v31 }
 0x114   : > { %415 = vmatpush1.bf16.msra.mxu0 %v871_v19 }
 0x115   : > { %416 = vmatprep.subr.bf16.mxu0 %v870_v23 }
 0x118   : > { %417 = vmatpush1.bf16.msra.mxu0 %v869_v29 }
 0x119   : > { %418 = vmatprep.subr.bf16.mxu0 %v868_v30 }
 0x11c   : > { %419 = vmatpush1.bf16.msra.mxu0 %v867_v32 }
 0x11f   : > { %823 = vmatmul.mubr.msk.bf16.vlgmr.msra.gmra.mxu0 %vm393_vm13, %v338_v33 }
 0x1df   : > { %v438_v34 = vpop.f32.mrf.mxu0 }
 0x1e0   : > { %v448_v37 = vmul.f32 %v438_v34, %v438_v34 }
 0x1e1   : > { %v440_v35 = vpop.f32.mrf.mxu0 }
 0x1e2   : > { %v445_v36 = vadd.f32 %v440_v35, %v438_v34  ;;  %v449_v25 = vmul.f32 %v440_v35, %v440_v35 }
 0x1e3   : > { %v442_v39 = vpop.f32.mrf.mxu0 }
 0x1e4   : > { %446 = vadd.xlane.f32.xlu0 %v445_v36  ;;  %v450_v40 = vadd.f32 %v449_v25, %v448_v37 }
 0x1e5   : > { %v443_v44 = vpop.f32.mrf.mxu0 }
 0x1e6   : > { %451 = vadd.xlane.f32.xlu1 %v450_v40 }
 0x26d   : > { %v447_v45 = vpop.xlane.xlu0 %446 }
 0x26e   : > { %v453_v24 = vmul.f32 0.00390625, %v447_v45 }
 0x26f   : > { %v452_v46 = vpop.xlane.xlu1 %451 }
 0x270   : > { %v454_v47 = vmul.f32 0.00390625, %v452_v46  ;;  %v455_v48 = vmul.f32 %v453_v24, %v453_v24  ;;  %v458_v52 = vsub.f32 %v438_v34, %v453_v24  ;;  %v459_v53 = vsub.f32 %v440_v35, %v453_v24 }
 0x272   : > { %v456_v49 = vsub.f32 %v454_v47, %v455_v48 }
 0x274   : > { %v457_v50 = vmax.f32 %v456_v49, 0.0 }
 0x276   : > { %v460_v51 = vadd.f32 1e-05, %v457_v50 }
 0x278   : > { %980 = vrsqrt.f32 %v460_v51 }
 0x285   : > { %v981_v54 = vpop.eup %980 }
 0x286   : > { %v1172_v55 = vmul.f32 %v981_v54, %v458_v52  ;;  %v1174_v56 = vmul.f32 %v981_v54, %v459_v53 }
 0x288   : > { %v464_v57 = vmax.f32 %v1172_v55, 0.0  ;;  %v465_v58 = vmax.f32 %v1174_v56, 0.0 }
 0x28a   : > { %v945_v59 = vpack.i.bf16 %v465_v58, %v464_v57 }
 0x28c   : > { %946 = vrot.lane.b32.xlu1 %v945_v59, %s993_s19  ;;  %941 = vrot.lane.b32.xlu0 %v945_v59, %s992_s18 }
 0x2fe   : > { %v947_v60 = vpop.permute.xlu1 %946  ;;  %v942_v61 = vpop.permute.xlu0 %941 }
 0x2ff   : > { %v949_v62 = vunpack.i.h.bf16 %v947_v60  ;;  %v948_v63 = vunpack.i.l.bf16 %v947_v60  ;;  %v944_v2 = vunpack.i.h.bf16 %v942_v61  ;;  %v943_v3 = vunpack.i.l.bf16 %v942_v61 }
 0x301   : > { %v476_v5 = vsel %vm194_vm1, %v948_v63, %v949_v62  ;;  %v477_v6 = vsel %vm194_vm1, %v949_v62, %v948_v63  ;;  %v470_v7 = vsel %vm185_vm0, %v943_v3, %v944_v2  ;;  %v471_v8 = vsel %vm185_vm0, %v944_v2, %v943_v3 }
 0x302   : > { %v566_v9 = vsel %vm1048_vm2, %v471_v8, %v476_v5  ;;  %v567_v10 = vsel %vm1056_vm4, %v470_v7, %v477_v6  ;;  %v1200_v14 = vsel %vm1052_vm3, %v476_v5, %v471_v8  ;;  %v1204_v15 = vsel %vm1060_vm5, %v477_v6, %v470_v7 }
 0x303   : > { %v955_v11 = vpack.i.bf16 %v567_v10, %v566_v9  ;;  %v975_v12 = vpack.i.bf16 %v1204_v15, %v1200_v14 }
 0x305   : > { %956 = vrot.lane.b32.xlu1 %v955_v11, %s995_s21  ;;  %951 = vrot.lane.b32.xlu0 %v955_v11, %s994_s20 }
 0x309   : > { %966 = vrot.lane.b32.xlu1 %v945_v59, %s995_s21  ;;  %961 = vrot.lane.b32.xlu0 %v945_v59, %s994_s20 }
 0x30d   : > { %976 = vrot.lane.b32.xlu1 %v975_v12, %s995_s21  ;;  %971 = vrot.lane.b32.xlu0 %v975_v12, %s994_s20 }
 0x377   : > { %v957_v16 = vpop.permute.xlu1 %956  ;;  %v952_v18 = vpop.permute.xlu0 %951 }
 0x378   : > { %v959_v13 = vunpack.i.h.bf16 %v957_v16  ;;  %v958_v19 = vunpack.i.l.bf16 %v957_v16  ;;  %v954_v20 = vunpack.i.h.bf16 %v952_v18  ;;  %v953_v21 = vunpack.i.l.bf16 %v952_v18 }
 0x37a   : > { %v572_v17 = vsel %vm203_vm6, %v953_v21, %v954_v20  ;;  %v579_v22 = vsel %vm212_vm7, %v959_v13, %v958_v19  ;;  %v573_v23 = vsel %vm203_vm6, %v954_v20, %v953_v21  ;;  %v578_v26 = vsel %vm212_vm7, %v958_v19, %v959_v13 }
 0x37b   : > { %v967_v27 = vpop.permute.xlu1 %966  ;;  %v962_v28 = vpop.permute.xlu0 %961  ;;  %v601_v29 = vsel %vm1097_vm8, %v572_v17, %v579_v22  ;;  %v600_v30 = vsel %vm1101_vm9, %v573_v23, %v578_v26  ;;  %v581_v31 = vsel %vm1105_vm10, %v579_v22, %v572_v17  ;;  %v580_v44 = vsel %vm1109_vm12, %v578_v26, %v573_v23 }
 0x37c   : > { %v969_v32 = vunpack.i.h.bf16 %v967_v27  ;;  %v968_v33 = vunpack.i.l.bf16 %v967_v27  ;;  %v964_v34 = vunpack.i.h.bf16 %v962_v28  ;;  %v963_v35 = vunpack.i.l.bf16 %v962_v28 }
 0x37d   : > { %v886_v36 = vpack.c.bf16 %v601_v29, %v601_v29  ;;  %v885_v37 = vpack.c.bf16 %v600_v30, %v600_v30  ;;  %v884_v40 = vpack.c.bf16 %v567_v10, %v581_v31  ;;  %v883_v60 = vpack.c.bf16 %v566_v9, %v580_v44 }
 0x37e   : > { %v534_v25 = vsel %vm212_vm7, %v969_v32, %v968_v33  ;;  %v527_v39 = vsel %vm203_vm6, %v963_v35, %v964_v34  ;;  %v533_v45 = vsel %vm212_vm7, %v968_v33, %v969_v32  ;;  %v528_v24 = vsel %vm203_vm6, %v964_v34, %v963_v35 }
 0x37f   : > { %843 = vmatprep.subr.msk.bf16.mxu1 %vm397_vm11, %v886_v36  ;;  %v670_v46 = vsel %vm397_vm11, %v885_v37, 0  ;;  %v977_v47 = vpop.permute.xlu1 %976  ;;  %v972_v48 = vpop.permute.xlu0 %971  ;;  %v556_v49 = vsel %vm1097_vm8, %v527_v39, %v534_v25  ;;  %v555_v62 = vsel %vm1101_vm9, %v528_v24, %v533_v45  ;;  %v536_v56 = vsel %vm1105_vm10, %v534_v25, %v527_v39 }
 0x380   : > { %682 = vmatpush1.bf16.msra.mxu1 %v670_v46  ;;  %v979_v50 = vunpack.i.h.bf16 %v977_v47  ;;  %v978_v51 = vunpack.i.l.bf16 %v977_v47  ;;  %v974_v52 = vunpack.i.h.bf16 %v972_v48  ;;  %v973_v53 = vunpack.i.l.bf16 %v972_v48 }
 0x381   : > { %683 = vmatprep.subr.bf16.mxu1 %v884_v40  ;;  %v882_v61 = vpack.c.bf16 %v556_v49, %v465_v58  ;;  %v881_v5 = vpack.c.bf16 %v555_v62, %v464_v57  ;;  %v535_v38 = vsel %vm1109_vm12, %v533_v45, %v528_v24 }
 0x382   : > { %v491_v54 = vsel %vm212_vm7, %v979_v50, %v978_v51  ;;  %v484_v59 = vsel %vm203_vm6, %v973_v53, %v974_v52  ;;  %v490_v63 = vsel %vm212_vm7, %v978_v51, %v979_v50  ;;  %v485_v2 = vsel %vm203_vm6, %v974_v52, %v973_v53 }
 0x383   : > { %v513_v3 = vsel %vm1097_vm8, %v484_v59, %v491_v54  ;;  %v512_v6 = vsel %vm1101_vm9, %v485_v2, %v490_v63  ;;  %v493_v4 = vsel %vm1105_vm10, %v491_v54, %v484_v59  ;;  %v492_v55 = vsel %vm1109_vm12, %v490_v63, %v485_v2 }
 0x384   : > { %684 = vmatpush1.bf16.msra.mxu1 %v883_v60  ;;  %v880_v58 = vpack.c.bf16 %v536_v56, %v513_v3  ;;  %v879_v7 = vpack.c.bf16 %v535_v38, %v512_v6  ;;  %v878_v8 = vpack.c.bf16 %v1204_v15, %v493_v4  ;;  %v877_v57 = vpack.c.bf16 %v1200_v14, %v492_v55 }
 0x385   : > { %685 = vmatprep.subr.bf16.mxu1 %v882_v61 }
 0x388   : > { %686 = vmatpush1.bf16.msra.mxu1 %v881_v5 }
 0x389   : > { %687 = vmatprep.subr.bf16.mxu1 %v880_v58 }
 0x38c   : > { %688 = vmatpush1.bf16.msra.mxu1 %v879_v7 }
 0x38d   : > { %689 = vmatprep.subr.bf16.mxu1 %v878_v8 }
 0x390   : > { %690 = vmatpush1.bf16.msra.mxu1 %v877_v57 }
 0x393   : > { %844 = vmatmul.mubr.msk.bf16.vlgmr.msra.gmra.mxu1 %vm393_vm13, %v611_v41 }
 0x453   : > { %v709_v42 = vpop.f32.mrf.mxu1 }
 0x454   : > { %v719_v11 = vmul.f32 %v709_v42, %v709_v42 }
 0x455   : > { %v711_v9 = vpop.f32.mrf.mxu1 }
 0x456   : > { %v716_v10 = vadd.f32 %v711_v9, %v709_v42  ;;  %v720_v12 = vmul.f32 %v711_v9, %v711_v9 }
 0x457   : > { %v713_v15 = vpop.f32.mrf.mxu1 }
 0x458   : > { %717 = vadd.xlane.f32.xlu0 %v716_v10  ;;  %v721_v43 = vadd.f32 %v720_v12, %v719_v11 }
 0x459   : > { %v714_v16 = vpop.f32.mrf.mxu1 }
 0x45a   : > { %722 = vadd.xlane.f32.xlu1 %v721_v43 }
 0x4e1   : > { %v718_v18 = vpop.xlane.xlu0 %717 }
 0x4e2   : > { %v724_v14 = vmul.f32 0.00390625, %v718_v18 }
 0x4e3   : > { %v723_v13 = vpop.xlane.xlu1 %722 }
 0x4e4   : > { %v725_v19 = vmul.f32 0.00390625, %v723_v13  ;;  %v726_v20 = vmul.f32 %v724_v14, %v724_v14  ;;  %v729_v23 = vsub.f32 %v709_v42, %v724_v14  ;;  %v730_v26 = vsub.f32 %v711_v9, %v724_v14 }
 0x4e6   : > { %v727_v21 = vsub.f32 %v725_v19, %v726_v20 }
 0x4e8   : > { %v728_v17 = vmax.f32 %v727_v21, 0.0 }
 0x4ea   : > { %v731_v22 = vadd.f32 1e-05, %v728_v17 }
 0x4ec   : > { %982 = vrsqrt.f32 %v731_v22 }
 0x4f9   : > { %v983_v27 = vpop.eup %982 }
 0x4fa   : > { %v733_v28 = vmul.f32 %v983_v27, %v729_v23  ;;  %v734_v29 = vmul.f32 %v983_v27, %v730_v26 }
 0x4fc   : > { %v735_v30 = vadd.f32 %v733_v28, %v1033_v0  ;;  %v736_v31 = vadd.f32 %v734_v29, %v1035_v1 }
 0x4fe   : > { %737 = vst [vmem:[%s170_s28] sm:$0xff] %v735_v30  ;;  %738 = vst [vmem:[%s170_s28 + $0x8] sm:$0xff] %v736_v31 }
 0x4ff PF: > { %s13_s12 = sadd.s32 1, %s990_s12  }
 0x500   : > { %p10_p4 = scmp.ge.s32.totalorder %s13_s12, 4  }
 0x502   :  { %12 = sbr.rel (!%p10_p4) target bundleno = 1 (0x1), region = 62 }

</bundles_post_ra>
